<compile_context>
chip_gen: v5e
topology: v5e:2x2
jax: 0.10.0
libtpu: 0.0.40
codegen_flags: <defaults>
</compile_context>

<pallas_src>
import functools

import jax
import jax.numpy as jnp
from jax.experimental import pallas as pl
from jax.experimental.pallas import tpu as pltpu


# ---------------------------------------------------------------------------
# Fused kernel: conv1+BN+ReLU -> pool1 -> conv2+BN+ReLU -> pool2
# ---------------------------------------------------------------------------
def _temporal_conv_fused_kernel(
    x_ref, w1_ref, s1_ref, b1_ref, w2_ref, s2_ref, b2_ref,  # inputs
    o_ref,                                                   # output
    p1_ref,                                                  # VMEM scratch
    *, ksize, t1, p1_len, t2, p2_len,
):
    # x_ref : (1, T0, C_in)   current batch element
    # w1_ref: (K, C_in, H)    layer-1 conv weight, tap-major
    # s1/b1 : (1, H)          folded BN1 scale / (conv-bias + BN1) shift
    # w2_ref: (K, H, H)       layer-2 conv weight, tap-major
    # s2/b2 : (1, H)
    # o_ref : (1, P2, H)      final output
    # p1_ref: (P1, H) f32     VMEM scratch for pooled layer-1 activations
    x = x_ref[0]                                  # (T0, C_in)
    hid = o_ref.shape[-1]

    s1 = s1_ref[...]                              # (1, H)
    b1 = b1_ref[...]
    s2 = s2_ref[...]
    b2 = b2_ref[...]

    # ---- layer 1: Conv1d(K, valid) + BN(eval, folded) + ReLU ---------------
    acc1 = jnp.zeros((t1, hid), jnp.float32)
    for k in range(ksize):                        # static unroll -> K MXU matmuls
        acc1 += jnp.dot(
            x[k:k + t1, :], w1_ref[k], preferred_element_type=jnp.float32
        )
    a1 = jnp.maximum(acc1 * s1 + b1, 0.0)         # (T1, H)

    # ---- pool1: MaxPool1d(2, stride 2, floor) into VMEM scratch ------------
    # Static 2-D slices only (no strided ref indexing, no 1-D vectors).
    for t in range(p1_len):
        p1_ref[t:t + 1, :] = jnp.maximum(
            a1[2 * t:2 * t + 1, :], a1[2 * t + 1:2 * t + 2, :]
        )

    # ---- layer 2: Conv1d(K, valid) + BN(eval, folded) + ReLU ---------------
    acc2 = jnp.zeros((t2, hid), jnp.float32)
    for k in range(ksize):
        acc2 += jnp.dot(
            p1_ref[k:k + t2, :], w2_ref[k], preferred_element_type=jnp.float32
        )
    a2 = jnp.maximum(acc2 * s2 + b2, 0.0)         # (T2, H)

    # ---- pool2 fused into the final (lane-dense) store ---------------------
    for s in range(p2_len):
        o_ref[0, s:s + 1, :] = jnp.maximum(
            a2[2 * s:2 * s + 1, :], a2[2 * s + 1:2 * s + 2, :]
        ).astype(o_ref.dtype)


# ---------------------------------------------------------------------------
# Wrapper
# ---------------------------------------------------------------------------
def temporal_conv_forward(x, params):
    """TemporalConv(conv_type=2) forward.  x: (B, T, input_size) -> (B, T', hidden)."""
    (w1, s1, b1), (w2, s2, b2) = params
    B, T0, C_in = x.shape
    K, _, H = w1.shape
    T1 = T0 - K + 1          # after conv1
    P1 = T1 // 2             # after pool1
    T2 = P1 - K + 1          # after conv2
    P2 = T2 // 2             # after pool2
    assert T2 >= 1 and P2 >= 1, "sequence too short for conv_type=2"

    kernel = functools.partial(
        _temporal_conv_fused_kernel, ksize=K, t1=T1, p1_len=P1, t2=T2, p2_len=P2
    )
    return pl.pallas_call(
        kernel,
        out_shape=jax.ShapeDtypeStruct((B, P2, H), x.dtype),
        grid=(B,),
        in_specs=[
            pl.BlockSpec((1, T0, C_in), lambda b: (b, 0, 0)),
            # weights / BN params: constant index_maps -> fetched once, VMEM-resident
            pl.BlockSpec((K, C_in, H), lambda b: (0, 0, 0)),
            pl.BlockSpec((1, H), lambda b: (0, 0)),
            pl.BlockSpec((1, H), lambda b: (0, 0)),
            pl.BlockSpec((K, H, H), lambda b: (0, 0, 0)),
            pl.BlockSpec((1, H), lambda b: (0, 0)),
            pl.BlockSpec((1, H), lambda b: (0, 0)),
        ],
        out_specs=pl.BlockSpec((1, P2, H), lambda b: (b, 0, 0)),
        scratch_shapes=[pltpu.VMEM((P1, H), jnp.float32)],
        compiler_params=pltpu.CompilerParams(
            dimension_semantics=("parallel",),
        ),
    )(x, w1, s1, b1, w2, s2, b2)


# ---------------------------------------------------------------------------
# Deterministic parameter init (mirrors nn.Conv1d / nn.BatchNorm1d shapes)
# ---------------------------------------------------------------------------
def init_params(key, input_size, hidden_size, eps=1e-5):
    params = []
    c_in = input_size
    for _ in range(2):  # two K5 layers in conv_type=2
        key, k_w, k_b, k_g, k_beta = jax.random.split(key, 5)
        ksz = 5
        bound = 1.0 / jnp.sqrt(jnp.float32(c_in * ksz))
        # PyTorch Conv1d weight layout: (C_out, C_in, K)
        w = jax.random.uniform(k_w, (hidden_size, c_in, ksz), jnp.float32, -bound, bound)
        b = jax.random.uniform(k_b, (hidden_size,), jnp.float32, -bound, bound)
        gamma = jax.random.uniform(k_g, (hidden_size,), jnp.float32, 0.5, 1.5)
        beta = jax.random.uniform(k_beta, (hidden_size,), jnp.float32, -0.5, 0.5)
        running_mean = jnp.zeros((hidden_size,), jnp.float32)
        running_var = jnp.ones((hidden_size,), jnp.float32)
        # Fold conv bias + eval-mode BN into one per-channel scale/shift.
        scale = gamma / jnp.sqrt(running_var + eps)
        shift = (b - running_mean) * scale + beta
        w_tap_major = jnp.transpose(w, (2, 1, 0))  # (K, C_in, C_out)
        params.append((w_tap_major, scale.reshape(1, -1), shift.reshape(1, -1)))
        c_in = hidden_size
    return params


# ---------------------------------------------------------------------------
# Plain-JAX reference (same semantics) for a correctness check
# ---------------------------------------------------------------------------
def _ref_forward(x, params):
    def conv_bn_relu_ref(x, w, scale, shift):
        K = w.shape[0]
        T_out = x.shape[1] - K + 1
        acc = jnp.zeros((x.shape[0], T_out, w.shape[2]), jnp.float32)
        for k in range(K):
            acc = acc + jnp.einsum("btc,cd->btd", x[:, k:k + T_out, :], w[k])
        return jnp.maximum(acc * scale + shift, 0.0)

    def pool_ref(x):
        B, T, C = x.shape
        T_out = T // 2
        return x[:, : 2 * T_out].reshape(B, T_out, 2, C).max(axis=2)

    h = conv_bn_relu_ref(x, *params[0])
    h = pool_ref(h)
    h = conv_bn_relu_ref(h, *params[1])
    h = pool_ref(h)
    return h


if __name__ == "__main__":
    # small but lane-friendly demo shapes (hidden = 128 keeps stores lane-dense)
    B, T, INPUT_SIZE, HIDDEN_SIZE = 2, 24, 64, 128

    key = jax.random.PRNGKey(0)
    key, kx = jax.random.split(key)
    x = jax.random.normal(kx, (B, T, INPUT_SIZE), jnp.float32)

    params = init_params(key, INPUT_SIZE, HIDDEN_SIZE)

    out = temporal_conv_forward(x, params)
    out = jax.block_until_ready(out)

    ref = _ref_forward(x, params)
    assert out.shape == ref.shape, (out.shape, ref.shape)
    assert jnp.allclose(out, ref, atol=1e-4, rtol=1e-4), "mismatch vs reference"

    print("KERNEL_OK")
</pallas_src>

<mosaic_0001>
module attributes {stable_mosaic.version = 11 : i64} {
  func.func @_temporal_conv_fused_kernel(%arg0: i32, %arg1: memref<1x24x64xf32, #tpu.memory_space<vmem>>, %arg2: memref<5x64x128xf32, #tpu.memory_space<vmem>>, %arg3: memref<1x128xf32, #tpu.memory_space<vmem>>, %arg4: memref<1x128xf32, #tpu.memory_space<vmem>>, %arg5: memref<5x128x128xf32, #tpu.memory_space<vmem>>, %arg6: memref<1x128xf32, #tpu.memory_space<vmem>>, %arg7: memref<1x128xf32, #tpu.memory_space<vmem>>, %arg8: memref<1x3x128xf32, #tpu.memory_space<vmem>>, %arg9: memref<10x128xf32, #tpu.memory_space<vmem>>) attributes {dimension_semantics = [#tpu.dimension_semantics<parallel>], iteration_bounds = array<i64: 2>, scalar_prefetch = 0 : i64, scratch_operands = 1 : i64, tpu.core_type = #tpu.core_type<tc>, window_params = [{transform_indices = @transform_0, window_bounds = array<i64: 1, 24, 64>}, {pipeline_mode = #tpu.pipeline_mode<synchronous>, transform_indices = @transform_1, window_bounds = array<i64: 5, 64, 128>}, {pipeline_mode = #tpu.pipeline_mode<synchronous>, transform_indices = @transform_2, window_bounds = array<i64: 1, 128>}, {pipeline_mode = #tpu.pipeline_mode<synchronous>, transform_indices = @transform_3, window_bounds = array<i64: 1, 128>}, {pipeline_mode = #tpu.pipeline_mode<synchronous>, transform_indices = @transform_4, window_bounds = array<i64: 5, 128, 128>}, {pipeline_mode = #tpu.pipeline_mode<synchronous>, transform_indices = @transform_5, window_bounds = array<i64: 1, 128>}, {pipeline_mode = #tpu.pipeline_mode<synchronous>, transform_indices = @transform_6, window_bounds = array<i64: 1, 128>}, {transform_indices = @transform_7, window_bounds = array<i64: 1, 3, 128>}]} {
    %c0 = arith.constant 0 : index
    %c0_0 = arith.constant 0 : index
    %c0_1 = arith.constant 0 : index
    %0 = vector.load %arg1[%c0, %c0_0, %c0_1] : memref<1x24x64xf32, #tpu.memory_space<vmem>>, vector<1x24x64xf32>
    %1 = vector.shape_cast %0 : vector<1x24x64xf32> to vector<24x64xf32>
    %c0_2 = arith.constant 0 : index
    %c0_3 = arith.constant 0 : index
    %2 = vector.load %arg3[%c0_2, %c0_3] : memref<1x128xf32, #tpu.memory_space<vmem>>, vector<1x128xf32>
    %c0_4 = arith.constant 0 : index
    %c0_5 = arith.constant 0 : index
    %3 = vector.load %arg4[%c0_4, %c0_5] : memref<1x128xf32, #tpu.memory_space<vmem>>, vector<1x128xf32>
    %c0_6 = arith.constant 0 : index
    %c0_7 = arith.constant 0 : index
    %4 = vector.load %arg6[%c0_6, %c0_7] : memref<1x128xf32, #tpu.memory_space<vmem>>, vector<1x128xf32>
    %c0_8 = arith.constant 0 : index
    %c0_9 = arith.constant 0 : index
    %5 = vector.load %arg7[%c0_8, %c0_9] : memref<1x128xf32, #tpu.memory_space<vmem>>, vector<1x128xf32>
    %cst = arith.constant 0.000000e+00 : f32
    %6 = vector.broadcast %cst : f32 to vector<20x128xf32>
    %7 = vector.extract_strided_slice %1 {offsets = [0, 0], sizes = [20, 64], strides = [1, 1]} : vector<24x64xf32> to vector<20x64xf32>
    %c0_10 = arith.constant 0 : index
    %c0_11 = arith.constant 0 : index
    %c0_12 = arith.constant 0 : index
    %8 = vector.load %arg2[%c0_10, %c0_11, %c0_12] : memref<5x64x128xf32, #tpu.memory_space<vmem>>, vector<1x64x128xf32>
    %9 = vector.shape_cast %8 : vector<1x64x128xf32> to vector<64x128xf32>
    %cst_13 = arith.constant dense<0.000000e+00> : vector<20x128xf32>
    %10 = tpu.matmul %7, %9, %cst_13 {dimension_numbers = #tpu.dot_dimension_numbers<[1], [0], [0], [1], [0, 0, 1, 1], [], []>} : vector<20x64xf32>, vector<64x128xf32>, vector<20x128xf32> -> vector<20x128xf32>
    %11 = arith.addf %6, %10 : vector<20x128xf32>
    %12 = vector.extract_strided_slice %1 {offsets = [1, 0], sizes = [20, 64], strides = [1, 1]} : vector<24x64xf32> to vector<20x64xf32>
    %c1 = arith.constant 1 : index
    %c0_14 = arith.constant 0 : index
    %c0_15 = arith.constant 0 : index
    %13 = vector.load %arg2[%c1, %c0_14, %c0_15] : memref<5x64x128xf32, #tpu.memory_space<vmem>>, vector<1x64x128xf32>
    %14 = vector.shape_cast %13 : vector<1x64x128xf32> to vector<64x128xf32>
    %cst_16 = arith.constant dense<0.000000e+00> : vector<20x128xf32>
    %15 = tpu.matmul %12, %14, %cst_16 {dimension_numbers = #tpu.dot_dimension_numbers<[1], [0], [0], [1], [0, 0, 1, 1], [], []>} : vector<20x64xf32>, vector<64x128xf32>, vector<20x128xf32> -> vector<20x128xf32>
    %16 = arith.addf %11, %15 : vector<20x128xf32>
    %17 = vector.extract_strided_slice %1 {offsets = [2, 0], sizes = [20, 64], strides = [1, 1]} : vector<24x64xf32> to vector<20x64xf32>
    %c2 = arith.constant 2 : index
    %c0_17 = arith.constant 0 : index
    %c0_18 = arith.constant 0 : index
    %18 = vector.load %arg2[%c2, %c0_17, %c0_18] : memref<5x64x128xf32, #tpu.memory_space<vmem>>, vector<1x64x128xf32>
    %19 = vector.shape_cast %18 : vector<1x64x128xf32> to vector<64x128xf32>
    %cst_19 = arith.constant dense<0.000000e+00> : vector<20x128xf32>
    %20 = tpu.matmul %17, %19, %cst_19 {dimension_numbers = #tpu.dot_dimension_numbers<[1], [0], [0], [1], [0, 0, 1, 1], [], []>} : vector<20x64xf32>, vector<64x128xf32>, vector<20x128xf32> -> vector<20x128xf32>
    %21 = arith.addf %16, %20 : vector<20x128xf32>
    %22 = vector.extract_strided_slice %1 {offsets = [3, 0], sizes = [20, 64], strides = [1, 1]} : vector<24x64xf32> to vector<20x64xf32>
    %c3 = arith.constant 3 : index
    %c0_20 = arith.constant 0 : index
    %c0_21 = arith.constant 0 : index
    %23 = vector.load %arg2[%c3, %c0_20, %c0_21] : memref<5x64x128xf32, #tpu.memory_space<vmem>>, vector<1x64x128xf32>
    %24 = vector.shape_cast %23 : vector<1x64x128xf32> to vector<64x128xf32>
    %cst_22 = arith.constant dense<0.000000e+00> : vector<20x128xf32>
    %25 = tpu.matmul %22, %24, %cst_22 {dimension_numbers = #tpu.dot_dimension_numbers<[1], [0], [0], [1], [0, 0, 1, 1], [], []>} : vector<20x64xf32>, vector<64x128xf32>, vector<20x128xf32> -> vector<20x128xf32>
    %26 = arith.addf %21, %25 : vector<20x128xf32>
    %27 = vector.extract_strided_slice %1 {offsets = [4, 0], sizes = [20, 64], strides = [1, 1]} : vector<24x64xf32> to vector<20x64xf32>
    %c4 = arith.constant 4 : index
    %c0_23 = arith.constant 0 : index
    %c0_24 = arith.constant 0 : index
    %28 = vector.load %arg2[%c4, %c0_23, %c0_24] : memref<5x64x128xf32, #tpu.memory_space<vmem>>, vector<1x64x128xf32>
    %29 = vector.shape_cast %28 : vector<1x64x128xf32> to vector<64x128xf32>
    %cst_25 = arith.constant dense<0.000000e+00> : vector<20x128xf32>
    %30 = tpu.matmul %27, %29, %cst_25 {dimension_numbers = #tpu.dot_dimension_numbers<[1], [0], [0], [1], [0, 0, 1, 1], [], []>} : vector<20x64xf32>, vector<64x128xf32>, vector<20x128xf32> -> vector<20x128xf32>
    %31 = arith.addf %26, %30 : vector<20x128xf32>
    %32 = vector.broadcast %2 : vector<1x128xf32> to vector<20x128xf32>
    %33 = arith.mulf %31, %32 : vector<20x128xf32>
    %34 = vector.broadcast %3 : vector<1x128xf32> to vector<20x128xf32>
    %35 = arith.addf %33, %34 : vector<20x128xf32>
    %cst_26 = arith.constant 0.000000e+00 : f32
    %36 = vector.broadcast %cst_26 : f32 to vector<20x128xf32>
    %37 = arith.maximumf %35, %36 : vector<20x128xf32>
    %38 = vector.extract_strided_slice %37 {offsets = [0, 0], sizes = [1, 128], strides = [1, 1]} : vector<20x128xf32> to vector<1x128xf32>
    %39 = vector.extract_strided_slice %37 {offsets = [1, 0], sizes = [1, 128], strides = [1, 1]} : vector<20x128xf32> to vector<1x128xf32>
    %40 = arith.maximumf %38, %39 : vector<1x128xf32>
    %c0_27 = arith.constant 0 : index
    %c0_28 = arith.constant 0 : index
    %41 = vector.load %arg9[%c0_27, %c0_28] : memref<10x128xf32, #tpu.memory_space<vmem>>, vector<1x128xf32>
    tpu.vector_store %arg9[%c0_27, %c0_28], %40 {strides = array<i32>} : memref<10x128xf32, #tpu.memory_space<vmem>>, vector<1x128xf32>,
    %42 = vector.extract_strided_slice %37 {offsets = [2, 0], sizes = [1, 128], strides = [1, 1]} : vector<20x128xf32> to vector<1x128xf32>
    %43 = vector.extract_strided_slice %37 {offsets = [3, 0], sizes = [1, 128], strides = [1, 1]} : vector<20x128xf32> to vector<1x128xf32>
    %44 = arith.maximumf %42, %43 : vector<1x128xf32>
    %c1_29 = arith.constant 1 : index
    %c0_30 = arith.constant 0 : index
    %45 = vector.load %arg9[%c1_29, %c0_30] : memref<10x128xf32, #tpu.memory_space<vmem>>, vector<1x128xf32>
    tpu.vector_store %arg9[%c1_29, %c0_30], %44 {strides = array<i32>} : memref<10x128xf32, #tpu.memory_space<vmem>>, vector<1x128xf32>,
    %46 = vector.extract_strided_slice %37 {offsets = [4, 0], sizes = [1, 128], strides = [1, 1]} : vector<20x128xf32> to vector<1x128xf32>
    %47 = vector.extract_strided_slice %37 {offsets = [5, 0], sizes = [1, 128], strides = [1, 1]} : vector<20x128xf32> to vector<1x128xf32>
    %48 = arith.maximumf %46, %47 : vector<1x128xf32>
    %c2_31 = arith.constant 2 : index
    %c0_32 = arith.constant 0 : index
    %49 = vector.load %arg9[%c2_31, %c0_32] : memref<10x128xf32, #tpu.memory_space<vmem>>, vector<1x128xf32>
    tpu.vector_store %arg9[%c2_31, %c0_32], %48 {strides = array<i32>} : memref<10x128xf32, #tpu.memory_space<vmem>>, vector<1x128xf32>,
    %50 = vector.extract_strided_slice %37 {offsets = [6, 0], sizes = [1, 128], strides = [1, 1]} : vector<20x128xf32> to vector<1x128xf32>
    %51 = vector.extract_strided_slice %37 {offsets = [7, 0], sizes = [1, 128], strides = [1, 1]} : vector<20x128xf32> to vector<1x128xf32>
    %52 = arith.maximumf %50, %51 : vector<1x128xf32>
    %c3_33 = arith.constant 3 : index
    %c0_34 = arith.constant 0 : index
    %53 = vector.load %arg9[%c3_33, %c0_34] : memref<10x128xf32, #tpu.memory_space<vmem>>, vector<1x128xf32>
    tpu.vector_store %arg9[%c3_33, %c0_34], %52 {strides = array<i32>} : memref<10x128xf32, #tpu.memory_space<vmem>>, vector<1x128xf32>,
    %54 = vector.extract_strided_slice %37 {offsets = [8, 0], sizes = [1, 128], strides = [1, 1]} : vector<20x128xf32> to vector<1x128xf32>
    %55 = vector.extract_strided_slice %37 {offsets = [9, 0], sizes = [1, 128], strides = [1, 1]} : vector<20x128xf32> to vector<1x128xf32>
    %56 = arith.maximumf %54, %55 : vector<1x128xf32>
    %c4_35 = arith.constant 4 : index
    %c0_36 = arith.constant 0 : index
    %57 = vector.load %arg9[%c4_35, %c0_36] : memref<10x128xf32, #tpu.memory_space<vmem>>, vector<1x128xf32>
    tpu.vector_store %arg9[%c4_35, %c0_36], %56 {strides = array<i32>} : memref<10x128xf32, #tpu.memory_space<vmem>>, vector<1x128xf32>,
    %58 = vector.extract_strided_slice %37 {offsets = [10, 0], sizes = [1, 128], strides = [1, 1]} : vector<20x128xf32> to vector<1x128xf32>
    %59 = vector.extract_strided_slice %37 {offsets = [11, 0], sizes = [1, 128], strides = [1, 1]} : vector<20x128xf32> to vector<1x128xf32>
    %60 = arith.maximumf %58, %59 : vector<1x128xf32>
    %c5 = arith.constant 5 : index
    %c0_37 = arith.constant 0 : index
    %61 = vector.load %arg9[%c5, %c0_37] : memref<10x128xf32, #tpu.memory_space<vmem>>, vector<1x128xf32>
    tpu.vector_store %arg9[%c5, %c0_37], %60 {strides = array<i32>} : memref<10x128xf32, #tpu.memory_space<vmem>>, vector<1x128xf32>,
    %62 = vector.extract_strided_slice %37 {offsets = [12, 0], sizes = [1, 128], strides = [1, 1]} : vector<20x128xf32> to vector<1x128xf32>
    %63 = vector.extract_strided_slice %37 {offsets = [13, 0], sizes = [1, 128], strides = [1, 1]} : vector<20x128xf32> to vector<1x128xf32>
    %64 = arith.maximumf %62, %63 : vector<1x128xf32>
    %c6 = arith.constant 6 : index
    %c0_38 = arith.constant 0 : index
    %65 = vector.load %arg9[%c6, %c0_38] : memref<10x128xf32, #tpu.memory_space<vmem>>, vector<1x128xf32>
    tpu.vector_store %arg9[%c6, %c0_38], %64 {strides = array<i32>} : memref<10x128xf32, #tpu.memory_space<vmem>>, vector<1x128xf32>,
    %66 = vector.extract_strided_slice %37 {offsets = [14, 0], sizes = [1, 128], strides = [1, 1]} : vector<20x128xf32> to vector<1x128xf32>
    %67 = vector.extract_strided_slice %37 {offsets = [15, 0], sizes = [1, 128], strides = [1, 1]} : vector<20x128xf32> to vector<1x128xf32>
    %68 = arith.maximumf %66, %67 : vector<1x128xf32>
    %c7 = arith.constant 7 : index
    %c0_39 = arith.constant 0 : index
    %69 = vector.load %arg9[%c7, %c0_39] : memref<10x128xf32, #tpu.memory_space<vmem>>, vector<1x128xf32>
    tpu.vector_store %arg9[%c7, %c0_39], %68 {strides = array<i32>} : memref<10x128xf32, #tpu.memory_space<vmem>>, vector<1x128xf32>,
    %70 = vector.extract_strided_slice %37 {offsets = [16, 0], sizes = [1, 128], strides = [1, 1]} : vector<20x128xf32> to vector<1x128xf32>
    %71 = vector.extract_strided_slice %37 {offsets = [17, 0], sizes = [1, 128], strides = [1, 1]} : vector<20x128xf32> to vector<1x128xf32>
    %72 = arith.maximumf %70, %71 : vector<1x128xf32>
    %c8 = arith.constant 8 : index
    %c0_40 = arith.constant 0 : index
    %73 = vector.load %arg9[%c8, %c0_40] : memref<10x128xf32, #tpu.memory_space<vmem>>, vector<1x128xf32>
    tpu.vector_store %arg9[%c8, %c0_40], %72 {strides = array<i32>} : memref<10x128xf32, #tpu.memory_space<vmem>>, vector<1x128xf32>,
    %74 = vector.extract_strided_slice %37 {offsets = [18, 0], sizes = [1, 128], strides = [1, 1]} : vector<20x128xf32> to vector<1x128xf32>
    %75 = vector.extract_strided_slice %37 {offsets = [19, 0], sizes = [1, 128], strides = [1, 1]} : vector<20x128xf32> to vector<1x128xf32>
    %76 = arith.maximumf %74, %75 : vector<1x128xf32>
    %c9 = arith.constant 9 : index
    %c0_41 = arith.constant 0 : index
    %77 = vector.load %arg9[%c9, %c0_41] : memref<10x128xf32, #tpu.memory_space<vmem>>, vector<1x128xf32>
    tpu.vector_store %arg9[%c9, %c0_41], %76 {strides = array<i32>} : memref<10x128xf32, #tpu.memory_space<vmem>>, vector<1x128xf32>,
    %cst_42 = arith.constant 0.000000e+00 : f32
    %78 = vector.broadcast %cst_42 : f32 to vector<6x128xf32>
    %c0_43 = arith.constant 0 : index
    %c0_44 = arith.constant 0 : index
    %79 = vector.load %arg9[%c0_43, %c0_44] : memref<10x128xf32, #tpu.memory_space<vmem>>, vector<6x128xf32>
    %c0_45 = arith.constant 0 : index
    %c0_46 = arith.constant 0 : index
    %c0_47 = arith.constant 0 : index
    %80 = vector.load %arg5[%c0_45, %c0_46, %c0_47] : memref<5x128x128xf32, #tpu.memory_space<vmem>>, vector<1x128x128xf32>
    %81 = vector.shape_cast %80 : vector<1x128x128xf32> to vector<128x128xf32>
    %cst_48 = arith.constant dense<0.000000e+00> : vector<6x128xf32>
    %82 = tpu.matmul %79, %81, %cst_48 {dimension_numbers = #tpu.dot_dimension_numbers<[1], [0], [0], [1], [0, 0, 1, 1], [], []>} : vector<6x128xf32>, vector<128x128xf32>, vector<6x128xf32> -> vector<6x128xf32>
    %83 = arith.addf %78, %82 : vector<6x128xf32>
    %c1_49 = arith.constant 1 : index
    %c0_50 = arith.constant 0 : index
    %84 = vector.load %arg9[%c1_49, %c0_50] : memref<10x128xf32, #tpu.memory_space<vmem>>, vector<6x128xf32>
    %c1_51 = arith.constant 1 : index
    %c0_52 = arith.constant 0 : index
    %c0_53 = arith.constant 0 : index
    %85 = vector.load %arg5[%c1_51, %c0_52, %c0_53] : memref<5x128x128xf32, #tpu.memory_space<vmem>>, vector<1x128x128xf32>
    %86 = vector.shape_cast %85 : vector<1x128x128xf32> to vector<128x128xf32>
    %cst_54 = arith.constant dense<0.000000e+00> : vector<6x128xf32>
    %87 = tpu.matmul %84, %86, %cst_54 {dimension_numbers = #tpu.dot_dimension_numbers<[1], [0], [0], [1], [0, 0, 1, 1], [], []>} : vector<6x128xf32>, vector<128x128xf32>, vector<6x128xf32> -> vector<6x128xf32>
    %88 = arith.addf %83, %87 : vector<6x128xf32>
    %c2_55 = arith.constant 2 : index
    %c0_56 = arith.constant 0 : index
    %89 = vector.load %arg9[%c2_55, %c0_56] : memref<10x128xf32, #tpu.memory_space<vmem>>, vector<6x128xf32>
    %c2_57 = arith.constant 2 : index
    %c0_58 = arith.constant 0 : index
    %c0_59 = arith.constant 0 : index
    %90 = vector.load %arg5[%c2_57, %c0_58, %c0_59] : memref<5x128x128xf32, #tpu.memory_space<vmem>>, vector<1x128x128xf32>
    %91 = vector.shape_cast %90 : vector<1x128x128xf32> to vector<128x128xf32>
    %cst_60 = arith.constant dense<0.000000e+00> : vector<6x128xf32>
    %92 = tpu.matmul %89, %91, %cst_60 {dimension_numbers = #tpu.dot_dimension_numbers<[1], [0], [0], [1], [0, 0, 1, 1], [], []>} : vector<6x128xf32>, vector<128x128xf32>, vector<6x128xf32> -> vector<6x128xf32>
    %93 = arith.addf %88, %92 : vector<6x128xf32>
    %c3_61 = arith.constant 3 : index
    %c0_62 = arith.constant 0 : index
    %94 = vector.load %arg9[%c3_61, %c0_62] : memref<10x128xf32, #tpu.memory_space<vmem>>, vector<6x128xf32>
    %c3_63 = arith.constant 3 : index
    %c0_64 = arith.constant 0 : index
    %c0_65 = arith.constant 0 : index
    %95 = vector.load %arg5[%c3_63, %c0_64, %c0_65] : memref<5x128x128xf32, #tpu.memory_space<vmem>>, vector<1x128x128xf32>
    %96 = vector.shape_cast %95 : vector<1x128x128xf32> to vector<128x128xf32>
    %cst_66 = arith.constant dense<0.000000e+00> : vector<6x128xf32>
    %97 = tpu.matmul %94, %96, %cst_66 {dimension_numbers = #tpu.dot_dimension_numbers<[1], [0], [0], [1], [0, 0, 1, 1], [], []>} : vector<6x128xf32>, vector<128x128xf32>, vector<6x128xf32> -> vector<6x128xf32>
    %98 = arith.addf %93, %97 : vector<6x128xf32>
    %c4_67 = arith.constant 4 : index
    %c0_68 = arith.constant 0 : index
    %99 = vector.load %arg9[%c4_67, %c0_68] : memref<10x128xf32, #tpu.memory_space<vmem>>, vector<6x128xf32>
    %c4_69 = arith.constant 4 : index
    %c0_70 = arith.constant 0 : index
    %c0_71 = arith.constant 0 : index
    %100 = vector.load %arg5[%c4_69, %c0_70, %c0_71] : memref<5x128x128xf32, #tpu.memory_space<vmem>>, vector<1x128x128xf32>
    %101 = vector.shape_cast %100 : vector<1x128x128xf32> to vector<128x128xf32>
    %cst_72 = arith.constant dense<0.000000e+00> : vector<6x128xf32>
    %102 = tpu.matmul %99, %101, %cst_72 {dimension_numbers = #tpu.dot_dimension_numbers<[1], [0], [0], [1], [0, 0, 1, 1], [], []>} : vector<6x128xf32>, vector<128x128xf32>, vector<6x128xf32> -> vector<6x128xf32>
    %103 = arith.addf %98, %102 : vector<6x128xf32>
    %104 = vector.broadcast %4 : vector<1x128xf32> to vector<6x128xf32>
    %105 = arith.mulf %103, %104 : vector<6x128xf32>
    %106 = vector.broadcast %5 : vector<1x128xf32> to vector<6x128xf32>
    %107 = arith.addf %105, %106 : vector<6x128xf32>
    %cst_73 = arith.constant 0.000000e+00 : f32
    %108 = vector.broadcast %cst_73 : f32 to vector<6x128xf32>
    %109 = arith.maximumf %107, %108 : vector<6x128xf32>
    %110 = vector.extract_strided_slice %109 {offsets = [0, 0], sizes = [1, 128], strides = [1, 1]} : vector<6x128xf32> to vector<1x128xf32>
    %111 = vector.extract_strided_slice %109 {offsets = [1, 0], sizes = [1, 128], strides = [1, 1]} : vector<6x128xf32> to vector<1x128xf32>
    %112 = arith.maximumf %110, %111 : vector<1x128xf32>
    %c0_74 = arith.constant 0 : index
    %c0_75 = arith.constant 0 : index
    %c0_76 = arith.constant 0 : index
    %113 = vector.load %arg8[%c0_74, %c0_75, %c0_76] : memref<1x3x128xf32, #tpu.memory_space<vmem>>, vector<1x1x128xf32>
    %114 = vector.shape_cast %113 : vector<1x1x128xf32> to vector<1x128xf32>
    %115 = vector.shape_cast %112 : vector<1x128xf32> to vector<1x1x128xf32>
    tpu.vector_store %arg8[%c0_74, %c0_75, %c0_76], %115 {strides = array<i32>} : memref<1x3x128xf32, #tpu.memory_space<vmem>>, vector<1x1x128xf32>,
    %116 = vector.extract_strided_slice %109 {offsets = [2, 0], sizes = [1, 128], strides = [1, 1]} : vector<6x128xf32> to vector<1x128xf32>
    %117 = vector.extract_strided_slice %109 {offsets = [3, 0], sizes = [1, 128], strides = [1, 1]} : vector<6x128xf32> to vector<1x128xf32>
    %118 = arith.maximumf %116, %117 : vector<1x128xf32>
    %c0_77 = arith.constant 0 : index
    %c1_78 = arith.constant 1 : index
    %c0_79 = arith.constant 0 : index
    %119 = vector.load %arg8[%c0_77, %c1_78, %c0_79] : memref<1x3x128xf32, #tpu.memory_space<vmem>>, vector<1x1x128xf32>
    %120 = vector.shape_cast %119 : vector<1x1x128xf32> to vector<1x128xf32>
    %121 = vector.shape_cast %118 : vector<1x128xf32> to vector<1x1x128xf32>
    tpu.vector_store %arg8[%c0_77, %c1_78, %c0_79], %121 {strides = array<i32>} : memref<1x3x128xf32, #tpu.memory_space<vmem>>, vector<1x1x128xf32>,
    %122 = vector.extract_strided_slice %109 {offsets = [4, 0], sizes = [1, 128], strides = [1, 1]} : vector<6x128xf32> to vector<1x128xf32>
    %123 = vector.extract_strided_slice %109 {offsets = [5, 0], sizes = [1, 128], strides = [1, 1]} : vector<6x128xf32> to vector<1x128xf32>
    %124 = arith.maximumf %122, %123 : vector<1x128xf32>
    %c0_80 = arith.constant 0 : index
    %c2_81 = arith.constant 2 : index
    %c0_82 = arith.constant 0 : index
    %125 = vector.load %arg8[%c0_80, %c2_81, %c0_82] : memref<1x3x128xf32, #tpu.memory_space<vmem>>, vector<1x1x128xf32>
    %126 = vector.shape_cast %125 : vector<1x1x128xf32> to vector<1x128xf32>
    %127 = vector.shape_cast %124 : vector<1x128xf32> to vector<1x1x128xf32>
    tpu.vector_store %arg8[%c0_80, %c2_81, %c0_82], %127 {strides = array<i32>} : memref<1x3x128xf32, #tpu.memory_space<vmem>>, vector<1x1x128xf32>,
    return
  }
  func.func @transform_0(%arg0: i32) -> (i32, i32, i32) {
    %c0_i32 = arith.constant 0 : i32
    %c0_i32_0 = arith.constant 0 : i32
    %c0_i32_1 = arith.constant 0 : i32
    return %arg0, %c0_i32, %c0_i32_0 : i32, i32, i32
  }
  func.func @transform_1(%arg0: i32) -> (i32, i32, i32) {
    %c0_i32 = arith.constant 0 : i32
    %c0_i32_0 = arith.constant 0 : i32
    %c0_i32_1 = arith.constant 0 : i32
    %c0_i32_2 = arith.constant 0 : i32
    return %c0_i32, %c0_i32_0, %c0_i32_1 : i32, i32, i32
  }
  func.func @transform_2(%arg0: i32) -> (i32, i32) {
    %c0_i32 = arith.constant 0 : i32
    %c0_i32_0 = arith.constant 0 : i32
    %c0_i32_1 = arith.constant 0 : i32
    return %c0_i32, %c0_i32_0 : i32, i32
  }
  func.func @transform_3(%arg0: i32) -> (i32, i32) {
    %c0_i32 = arith.constant 0 : i32
    %c0_i32_0 = arith.constant 0 : i32
    %c0_i32_1 = arith.constant 0 : i32
    return %c0_i32, %c0_i32_0 : i32, i32
  }
  func.func @transform_4(%arg0: i32) -> (i32, i32, i32) {
    %c0_i32 = arith.constant 0 : i32
    %c0_i32_0 = arith.constant 0 : i32
    %c0_i32_1 = arith.constant 0 : i32
    %c0_i32_2 = arith.constant 0 : i32
    return %c0_i32, %c0_i32_0, %c0_i32_1 : i32, i32, i32
  }
  func.func @transform_5(%arg0: i32) -> (i32, i32) {
    %c0_i32 = arith.constant 0 : i32
    %c0_i32_0 = arith.constant 0 : i32
    %c0_i32_1 = arith.constant 0 : i32
    return %c0_i32, %c0_i32_0 : i32, i32
  }
  func.func @transform_6(%arg0: i32) -> (i32, i32) {
    %c0_i32 = arith.constant 0 : i32
    %c0_i32_0 = arith.constant 0 : i32
    %c0_i32_1 = arith.constant 0 : i32
    return %c0_i32, %c0_i32_0 : i32, i32
  }
  func.func @transform_7(%arg0: i32) -> (i32, i32, i32) {
    %c0_i32 = arith.constant 0 : i32
    %c0_i32_0 = arith.constant 0 : i32
    %c0_i32_1 = arith.constant 0 : i32
    return %arg0, %c0_i32, %c0_i32_0 : i32, i32, i32
  }
}

</mosaic_0001>

<bundles_post_ra>
// kernel: tpu_custom_call.1
= control target key start
LH: loop header
LB: loop body
LE: loop exit
PB: predicated region body
PF: predicated region fallthrough
CT: control target
= control target key end

     0   :  { %12 = vsyncpa [#allocation4], 0  ;;  %s1379_s0 = inlined_call_operand.hbm [shape: f32[2,24,64], index: 0, kind: input, shape index: {}]   ;;  %s1380_s1 = inlined_call_operand.hbm [shape: f32[5,64,128], index: 1, kind: input, shape index: {}]   ;;  %s1381_s2 = inlined_call_operand.vmem [shape: f32[1,128], index: 2, kind: input, shape index: {}]   ;;  %s1382_s3 = inlined_call_operand.vmem [shape: f32[1,128], index: 3, kind: input, shape index: {}]   ;;  %s1383_s4 = inlined_call_operand.hbm [shape: f32[5,128,128], index: 4, kind: input, shape index: {}]   ;;  %s1384_s5 = inlined_call_operand.vmem [shape: f32[1,128], index: 5, kind: input, shape index: {}]   ;;  %s1385_s6 = inlined_call_operand.vmem [shape: f32[1,128], index: 6, kind: input, shape index: {}]   ;;  %s1386_s7 = inlined_call_operand.vmem [shape: f32[2,3,128], index: 7, kind: output, shape index: {}]  }
   0x1   :  { %14 = vsyncpa [#allocation4 + $0x1], 0 }
   0x2   :  { %15 = vsyncpa [#allocation6], 0  ;;  %s1187_s24 = smov 0   ;;  %s1189_s25 = smov 0  }
   0x3   :  { %s1191_s26 = smov 0   ;;  %s1193_s27 = smov 0  }
   0x4 LB: > { %s1206_s28 = sadd.s32 4294967295, %s1141_s27   ;;  %p41_p0 = scmp.ne.s32.totalorder %s1133_s25, %s1129_s24  ;;  %s1141_s27 = sphi %s1193_s27, %s1396_s27   ;;  %s1137_s26 = sphi %s1191_s26, %s1395_s26   ;;  %s1133_s25 = sphi %s1189_s25, %s1394_s25   ;;  %s1129_s24 = sphi %s1187_s24, %s1393_s24  }
   0x5   : > { %p42_p1 = scmp.eq.s32.totalorder %s1206_s28, 0  ;;  %p910_p2 = scmp.ge.s32.totalorder %s1141_s27, 1 }
   0x6   : > { %p204_p3 = scmp.lt.s32.totalorder %s1141_s27, 3  ;;  %s215_s9 = sshll.u32 %s1380_s1, 4  ;;  %s216_s9 = int_to_ptr.hbm [resolvable:$true] %s215_s9 }
   0x7   : > { %p1214_p4 = por %p42_p1, %p41_p0  ;;  %s1143_s11 = smov [#allocation5]  }
   0x8   : > { %p1221_p5 = pnand %p910_p2, %p204_p3  ;;  %s217_s12 = sshll.u32 %s1143_s11, 4  ;;  %s218_s12 = int_to_ptr.vmem [resolvable:$true] %s217_s12 }
   0x9   : > { %s235_s15 = sshll.u32 %s1383_s4, 4  ;;  %s1387_s16 = smov 128   ;;  %s236_s15 = int_to_ptr.hbm [resolvable:$true] %s235_s15 }
   0xa   : > { %p957_p6 = pneg %p1221_p5  ;;  %s1145_s17 = smov 8  }
   0xb   : > { %s1146_s18 = smov [#allocation7]   ;;  %s1239_s20 = sadd.s32 1, %s1141_s27  }
   0xc   : > { %p958_p7 = pnand %p957_p6, %p42_p1  ;;  %s237_s19 = sshll.u32 %s1146_s18, 4  ;;  %s238_s19 = int_to_ptr.vmem [resolvable:$true] %s237_s19 }
   0xd   : > { %s28_s21 = sadd.s32 1, %s1137_s26  ;;  %s25_s22 = ssub.s32 %s1141_s27, %s1239_s20 }
   0xe   : > { %960 = dma.hbm_to_vmem [thread:$0]  (!%p958_p7), %s216_s9, 5120, %s218_s12, [#allocation6], %s1387_s16, %s1387_s16, %s1145_s17  }
   0xf   : > { %963 = dma.hbm_to_vmem [thread:$0]  (!%p958_p7), %s236_s15, 10240, %s238_s19, [#allocation6], %s1387_s16, %s1387_s16, %s1145_s17  }
  0x10   : > { %p35_p8 = scmp.ne.s32.totalorder %s1137_s26, %s1133_s25  ;;  %p26_p9 = scmp.eq.s32.totalorder %s25_s22, 0 }
  0x11   : > { %p36_p10 = scmp.eq.s32.totalorder %s1141_s27, 0  ;;  %p970_p11 = scmp.lt.s32.totalorder %s1141_s27, 2 }
  0x12   : > { %s257_s23 = sand.u32 1, %s1137_s26   ;;  %s945_s8 = smul.u32 24, %s1141_s27 }
  0x13   : > { %s1250_s24 = scalar_select %p26_p9, %s1137_s26, %s28_s21  }
  0x14   : > { %p37_p12 = por %p36_p10, %p35_p8  ;;  %s944_s30 = smul.u32 24, %s257_s23 }
  0x15   : > { %s266_s13 = scalar_lea.hbm %s1379_s0, %s945_s8  ;;  %s258_s19 = scalar_lea.sflag [#allocation4], %s257_s23 }
  0x16   : > { %p1253_p13 = pnand %p970_p11, %p37_p12  ;;  %s261_s14 = scalar_lea.vmem [#allocation3], %s944_s30 }
  0x17   : > { %s269_s15 = sshll.u32 %s261_s14, 4  ;;  %s267_s18 = sshll.u32 %s266_s13, 4  ;;  %s270_s15 = int_to_ptr.vmem [resolvable:$true] %s269_s15  ;;  %s268_s18 = int_to_ptr.hbm [resolvable:$true] %s267_s18 }
  0x18   : > { %s1073_s21 = sshra.s32 %s268_s18, 4  ;;  %p1077_p2 = pneg %p1253_p13  ;;  %s1074_s21 = int_to_ptr.hbm [resolvable:$true] %s1073_s21 }
  0x19   : > { %s1075_s22 = scalar_lea.hbm %s1074_s21, 24  ;;  %s1080_s11 = scalar_lea.hbm %s1379_s0, 48 }
  0x1a   : > { %p1076_p0 = scmp.ne.s32.totalorder %s1074_s21, %s1075_s22  ;;  %p1081_p7 = scmp.lt.s32.totalorder %s1074_s21, %s1379_s0 }
  0x1b   : > { %p1082_p8 = scmp.lt.s32.totalorder %s1080_s11, %s1075_s22 }
  0x1c   : > { %p1078_p3 = pnand %p1077_p2, %p1076_p0 }
  0x1d   : > { %p1083_p9 = por %p1082_p8, %p1081_p7 }
  0x1e   : > { %p1079_p6 = pneg %p1078_p3 }
  0x20   : > { %p1084_p10 = pnand %p1083_p9, %p1079_p6 }
  0x22   : > { %1087 = shalt.err (!%p1084_p10)
}
  0x23   : > { %s1391_s23 = smov 128   ;;  %281 = sbr.rel (%p1221_p5) target bundleno = 402 (0x192), region = 48 }
  0x24   : > { %967 = dma.hbm_to_vmem [thread:$0]  (!%p1253_p13), %s268_s18, 384, %s270_s15, %s258_s19, %s1391_s23, %s1391_s23, %s1145_s17  }
  0x25   : > { %s283_s16 = sand.u32 (!%p1221_p5), 1, %s1133_s25  }
  0x26   : > { %s946_s30 = smul.u32 (!%p1221_p5), 24, %s283_s16  ;;  %s284_s13 = scalar_lea.sflag (!%p1221_p5), [#allocation4], %s283_s16 }
  0x28   : > { %s1276_s14 = scalar_lea.vmem [#allocation3], %s946_s30 }
  0x29   : > { %1120 = dma.done.wait (%p1214_p4), %s284_s13, 384  }
  0x2a   : > { %1122 = vsyncadd (%p1214_p4), %s284_s13, 4294966912 }
  0x2b   : > { %1124 = dma.done.wait (%p42_p1), [#allocation6], 15360  }
  0x2c   : > { %1126 = vsyncadd (%p42_p1), [#allocation6], 4294951936  ;;  %v346_v0 = vld [vmem:[#allocation5 + $0x38] sm:$0xff]  ;;  %v345_v1 = vld [vmem:[#allocation5 + $0x30] sm:$0xff]  ;;  %vm359_vm0 = vcmask 1046528   ;;  %vm365_vm1 = vcmask 523264  }
  0x2d   : > { %412 = vmatpush.msra.mxu2 %v346_v0  ;;  %v355_v2 = vld [vmem:[#allocation5 + $0x78] sm:$0xff]  ;;  %v354_v3 = vld [vmem:[#allocation5 + $0x70] sm:$0xff]  ;;  %v344_v4 = vld [vmem:[#allocation5 + $0x28] sm:$0xff]  ;;  %vm539_vm2 = vcmask 1043456   ;;  %vm489_vm3 = vcmask 1044480   ;;  %vm439_vm4 = vcmask 1045504  }
  0x2e   : > { %380 = vmatpush.msra.mxu0 %v355_v2  ;;  %936 = vmatpush.msra.mxu3 %v355_v2  ;;  %v353_v5 = vld [vmem:[#allocation5 + $0x68] sm:$0xff]  ;;  %v343_v6 = vld [vmem:[#allocation5 + $0x20] sm:$0xff]  ;;  %v342_v8 = vld [vmem:[#allocation5 + $0x18] sm:$0xff]  ;;  %p328_p1 = scmp.lt.s32.totalorder %s1206_s28, 1 }
  0x2f   : > { %413 = vmatpush.msra.mxu2 %v345_v1  ;;  %v352_v7 = vld [vmem:[#allocation5 + $0x60] sm:$0xff]  ;;  %v351_v9 = vld [vmem:[#allocation5 + $0x58] sm:$0xff]  ;;  %v341_v11 = vld [vmem:[#allocation5 + $0x10] sm:$0xff] }
  0x30   : > { %381 = vmatpush.msra.mxu0 %v354_v3  ;;  %937 = vmatpush.msra.mxu3 %v354_v3  ;;  %v1287_v10 = vld [vmem:[%s1276_s14 + $0x8] sm:$0xff]  ;;  %v1290_v12 = vld [vmem:[%s1276_s14] sm:$0xff]  ;;  %v339_v18 = vld [vmem:[#allocation5] sm:$0xff]  ;;  %s1398_s28 = smov (!%p328_p1, %s1206_s28), 1 }
  0x31   : > { %414 = vmatpush.msra.mxu2 %v344_v4  ;;  %v350_v13 = vld [vmem:[#allocation5 + $0x50] sm:$0xff]  ;;  %v340_v14 = vld [vmem:[#allocation5 + $0x8] sm:$0xff]  ;;  %v360_v15 = vrot.slane %v1290_v12, 1  ;;  %v361_v16 = vrot.slane %v1287_v10, 1  ;;  %v438_v19 = vld [vmem:[#allocation5 + $0xb8] sm:$0xff]  ;;  %v540_v44 = vrot.slane %v1290_v12, 4 }
  0x32   : > { %382 = vmatpush.msra.mxu0 %v353_v5  ;;  %938 = vmatpush.msra.mxu3 %v353_v5  ;;  %v349_v17 = vld [vmem:[#allocation5 + $0x48] sm:$0xff]  ;;  %v348_v20 = vld [vmem:[#allocation5 + $0x40] sm:$0xff]  ;;  %v538_v23 = vld [vmem:[#allocation5 + $0x138] sm:$0xff]  ;;  %v541_v45 = vrot.slane %v1287_v10, 4  ;;  %v490_v47 = vrot.slane %v1290_v12, 3  ;;  %v491_v48 = vrot.slane %v1287_v10, 3 }
  0x33   : > { %415 = vmatpush.msra.mxu2 %v343_v6  ;;  %v362_v21 = vsel %vm359_vm0, %v360_v15, %v361_v16  ;;  %v1296_v22 = vld [vmem:[%s1276_s14 + $0x10] sm:$0xff]  ;;  %v437_v24 = vld [vmem:[#allocation5 + $0xb0] sm:$0xff]  ;;  %v436_v27 = vld [vmem:[#allocation5 + $0xa8] sm:$0xff]  ;;  %v440_v54 = vrot.slane %v1290_v12, 2  ;;  %v441_v55 = vrot.slane %v1287_v10, 2  ;;  %s918_s22 = sshll.u32 %s1398_s28, 2 }
  0x34   : > { %383 = vmatpush.msra.mxu0 %v352_v7  ;;  %939 = vmatpush.msra.mxu3 %v352_v7  ;;  %v488_v25 = vld [vmem:[#allocation5 + $0xf8] sm:$0xff]  ;;  %v537_v26 = vld [vmem:[#allocation5 + $0x130] sm:$0xff]  ;;  %v363_v29 = vrot.slane %v1296_v22, 1  ;;  %v536_v30 = vld [vmem:[#allocation5 + $0x128] sm:$0xff]  ;;  %v542_v52 = vsel %vm539_vm2, %v540_v44, %v541_v45  ;;  %v492_v53 = vsel %vm489_vm3, %v490_v47, %v491_v48  ;;  %v543_v56 = vrot.slane %v1296_v22, 4  ;;  %s331_s12 = scalar_lea.vmem %s1386_s7, %s918_s22 }
  0x35   : > { %416 = vmatpush.msra.mxu2 %v342_v8  ;;  %v487_v28 = vld [vmem:[#allocation5 + $0xf0] sm:$0xff]  ;;  %v435_v31 = vld [vmem:[#allocation5 + $0xa0] sm:$0xff]  ;;  %v486_v32 = vld [vmem:[#allocation5 + $0xe8] sm:$0xff]  ;;  %v493_v57 = vrot.slane %v1296_v22, 3  ;;  %v442_v58 = vsel %vm439_vm4, %v440_v54, %v441_v55  ;;  %v443_v61 = vrot.slane %v1296_v22, 2 }
  0x36   : > { %384 = vmatpush.msra.mxu0 %v351_v9  ;;  %940 = vmatpush.msra.mxu3 %v351_v9  ;;  %v535_v33 = vld [vmem:[#allocation5 + $0x120] sm:$0xff]  ;;  %v434_v34 = vld [vmem:[#allocation5 + $0x98] sm:$0xff]  ;;  %v364_v35 = vsel %vm359_vm0, %v361_v16, %v363_v29  ;;  %v433_v38 = vld [vmem:[#allocation5 + $0x90] sm:$0xff]  ;;  %v544_v59 = vsel %vm539_vm2, %v541_v45, %v543_v56 }
  0x37   : > { %417 = vmatpush.msra.mxu2 %v341_v11  ;;  %v485_v36 = vld [vmem:[#allocation5 + $0xe0] sm:$0xff]  ;;  %v534_v37 = vld [vmem:[#allocation5 + $0x118] sm:$0xff]  ;;  %v533_v40 = vld [vmem:[#allocation5 + $0x110] sm:$0xff]  ;;  %v494_v60 = vsel %vm489_vm3, %v491_v48, %v493_v57  ;;  %v444_v62 = vsel %vm439_vm4, %v441_v55, %v443_v61 }
  0x38   : > { %385 = vmatpush.msra.mxu0 %v350_v13  ;;  %941 = vmatpush.msra.mxu3 %v350_v13  ;;  %v484_v39 = vld [vmem:[#allocation5 + $0xd8] sm:$0xff]  ;;  %v432_v41 = vld [vmem:[#allocation5 + $0x88] sm:$0xff]  ;;  %v483_v42 = vld [vmem:[#allocation5 + $0xd0] sm:$0xff] }
  0x39   : > { %418 = vmatpush.msra.mxu2 %v340_v14  ;;  %v532_v43 = vld [vmem:[#allocation5 + $0x108] sm:$0xff]  ;;  %v431_v46 = vld [vmem:[#allocation5 + $0x80] sm:$0xff]  ;;  %v651_v63 = vld [vmem:[#allocation7 + $0xf8] sm:$0xff] }
  0x3a   : > { %386 = vmatpush.msra.mxu0 %v349_v17  ;;  %942 = vmatpush.msra.mxu3 %v349_v17  ;;  %v482_v49 = vld [vmem:[#allocation5 + $0xc8] sm:$0xff]  ;;  %v531_v50 = vld [vmem:[#allocation5 + $0x100] sm:$0xff]  ;;  %v650_v0 = vld [vmem:[#allocation7 + $0xf0] sm:$0xff] }
  0x3b   : > { %419 = vmatpush.msra.mxu2 %v339_v18  ;;  %v481_v51 = vld [vmem:[#allocation5 + $0xc0] sm:$0xff]  ;;  %652 = vmatpush.msra.mxu1 %v651_v63  ;;  %v649_v1 = vld [vmem:[#allocation7 + $0xe8] sm:$0xff]  ;;  %v647_v3 = vld [vmem:[#allocation7 + $0xd8] sm:$0xff] }
  0x3c   : > { %922 = vmatmul.msk.f32.vlgmr.msra.gmra.mxu2 %vm365_vm1, %v1290_v12  ;;  %387 = vmatpush.msra.mxu0 %v348_v20  ;;  %v648_v2 = vld [vmem:[#allocation7 + $0xe0] sm:$0xff]  ;;  %v646_v4 = vld [vmem:[#allocation7 + $0xd0] sm:$0xff]  ;;  %v645_v5 = vld [vmem:[#allocation7 + $0xc8] sm:$0xff] }
  0x3d   : > { %459 = vmatpush.msrb.mxu2 %v438_v19  ;;  %919 = vmatmul.msk.f32.vlgmr.msra.gmra.mxu0 %vm365_vm1, %v362_v21  ;;  %v644_v6 = vld [vmem:[#allocation7 + $0xc0] sm:$0xff]  ;;  %v643_v7 = vld [vmem:[#allocation7 + $0xb8] sm:$0xff]  ;;  %v642_v8 = vld [vmem:[#allocation7 + $0xb0] sm:$0xff] }
  0x3e   : > { %943 = vmatpush.msra.mxu3 %v348_v20  ;;  %559 = vmatpush.msrb.mxu0 %v538_v23  ;;  %v641_v9 = vld [vmem:[#allocation7 + $0xa8] sm:$0xff]  ;;  %v633_v11 = vld [vmem:[#allocation7 + $0x78] sm:$0xff]  ;;  %v632_v14 = vld [vmem:[#allocation7 + $0x70] sm:$0xff] }
  0x3f   : > { %460 = vmatpush.msrb.mxu2 %v437_v24  ;;  %921 = vmatmul.msk.f32.vlgmr.msra.gmra.mxu3 %vm365_vm1, %v363_v29  ;;  %v709_v12 = vld [vmem:[#allocation7 + $0x178] sm:$0xff]  ;;  %v708_v15 = vld [vmem:[#allocation7 + $0x170] sm:$0xff]  ;;  %v631_v18 = vld [vmem:[#allocation7 + $0x68] sm:$0xff] }
  0x40   : > { %509 = vmatpush.msrb.mxu3 %v488_v25  ;;  %560 = vmatpush.msrb.mxu0 %v537_v26  ;;  %v639_v13 = vld [vmem:[#allocation7 + $0x98] sm:$0xff]  ;;  %v638_v16 = vld [vmem:[#allocation7 + $0x90] sm:$0xff]  ;;  %v707_v19 = vld [vmem:[#allocation7 + $0x168] sm:$0xff] }
  0x41   : > { %461 = vmatpush.msrb.mxu2 %v436_v27  ;;  %653 = vmatpush.msra.mxu1 %v650_v0  ;;  %v637_v20 = vld [vmem:[#allocation7 + $0x88] sm:$0xff]  ;;  %v630_v21 = vld [vmem:[#allocation7 + $0x60] sm:$0xff]  ;;  %v629_v25 = vld [vmem:[#allocation7 + $0x58] sm:$0xff] }
  0x42   : > { %510 = vmatpush.msrb.mxu3 %v487_v28  ;;  %561 = vmatpush.msrb.mxu0 %v536_v30  ;;  %v636_v23 = vld [vmem:[#allocation7 + $0x80] sm:$0xff]  ;;  %v705_v26 = vld [vmem:[#allocation7 + $0x158] sm:$0xff]  ;;  %v628_v29 = vld [vmem:[#allocation7 + $0x50] sm:$0xff] }
  0x43   : > { %462 = vmatpush.msrb.mxu2 %v435_v31  ;;  %654 = vmatpush.msra.mxu1 %v649_v1  ;;  %v748_v27 = vld [vmem:[#allocation7 + $0x1f8] sm:$0xff]  ;;  %v704_v30 = vld [vmem:[#allocation7 + $0x150] sm:$0xff]  ;;  %v699_v54 = vld [vmem:[#allocation7 + $0x128] sm:$0xff] }
  0x44   : > { %511 = vmatpush.msrb.mxu3 %v486_v32  ;;  %923 = vmatmul.msk.f32.gmra.mxu2 %vm365_vm1, %v1287_v10  ;;  %v640_v10 = vld [vmem:[#allocation7 + $0xa0] sm:$0xff]  ;;  %v787_v28 = vld [vmem:[#allocation7 + $0x278] sm:$0xff]  ;;  %v747_v31 = vld [vmem:[#allocation7 + $0x1f0] sm:$0xff] }
  0x45   : > { %562 = vmatpush.msrb.mxu0 %v535_v33  ;;  %463 = vmatpush.msrb.mxu2 %v434_v34  ;;  %v786_v32 = vld [vmem:[#allocation7 + $0x270] sm:$0xff]  ;;  %v627_v34 = vld [vmem:[#allocation7 + $0x48] sm:$0xff]  ;;  %v701_v44 = vld [vmem:[#allocation7 + $0x138] sm:$0xff] }
  0x46   : > { %920 = vmatmul.msk.f32.gmra.mxu0 %vm365_vm1, %v364_v35  ;;  %512 = vmatpush.msrb.mxu3 %v485_v36  ;;  %v703_v35 = vld [vmem:[#allocation7 + $0x148] sm:$0xff]  ;;  %v744_v45 = vld [vmem:[#allocation7 + $0x1d8] sm:$0xff]  ;;  %v624_v48 = vld [vmem:[#allocation7 + $0x30] sm:$0xff] }
  0x47   : > { %563 = vmatpush.msrb.mxu0 %v534_v37  ;;  %464 = vmatpush.msrb.mxu2 %v433_v38  ;;  %v746_v36 = vld [vmem:[#allocation7 + $0x1e8] sm:$0xff]  ;;  %v626_v38 = vld [vmem:[#allocation7 + $0x40] sm:$0xff]  ;;  %v697_v63 = vld [vmem:[#allocation7 + $0x118] sm:$0xff] }
  0x48   : > { %513 = vmatpush.msrb.mxu3 %v484_v39  ;;  %655 = vmatpush.msra.mxu1 %v648_v2  ;;  %v785_v37 = vld [vmem:[#allocation7 + $0x268] sm:$0xff]  ;;  %v702_v39 = vld [vmem:[#allocation7 + $0x140] sm:$0xff]  ;;  %v740_v0 = vld [vmem:[#allocation7 + $0x1b8] sm:$0xff] }
  0x49   : > { %564 = vmatpush.msrb.mxu0 %v533_v40  ;;  %465 = vmatpush.msrb.mxu2 %v432_v41  ;;  %v745_v40 = vld [vmem:[#allocation7 + $0x1e0] sm:$0xff]  ;;  %v742_v55 = vld [vmem:[#allocation7 + $0x1c8] sm:$0xff]  ;;  %v779_v1 = vld [vmem:[#allocation7 + $0x238] sm:$0xff] }
  0x4a   : > { %514 = vmatpush.msrb.mxu3 %v483_v42  ;;  %656 = vmatpush.msra.mxu1 %v647_v3  ;;  %v784_v41 = vld [vmem:[#allocation7 + $0x260] sm:$0xff]  ;;  %v620_v3 = vld [vmem:[#allocation7 + $0x10] sm:$0xff] }
  0x4b   : > { %565 = vmatpush.msrb.mxu0 %v532_v43  ;;  %466 = vmatpush.msrb.mxu2 %v431_v46  ;;  %v625_v43 = vld [vmem:[#allocation7 + $0x38] sm:$0xff] }
  0x4c   : > { %924 = vmatmul.msk.f32.gmra.mxu2 %vm365_vm1, %v1296_v22  ;;  %515 = vmatpush.msrb.mxu3 %v482_v49  ;;  %v706_v22 = vld [vmem:[#allocation7 + $0x160] sm:$0xff]  ;;  %v783_v46 = vld [vmem:[#allocation7 + $0x258] sm:$0xff]  ;;  %v700_v49 = vld [vmem:[#allocation7 + $0x130] sm:$0xff] }
  0x4d   : > { %566 = vmatpush.msrb.mxu0 %v531_v50  ;;  %657 = vmatpush.msra.mxu1 %v646_v4  ;;  %v743_v50 = vld [vmem:[#allocation7 + $0x1d0] sm:$0xff] }
  0x4e   : > { %516 = vmatpush.msrb.mxu3 %v481_v51  ;;  %931 = vmatmul.msk.f32.vlgmr.msrb.gmra.mxu0 %vm365_vm1, %v542_v52  ;;  %v782_v51 = vld [vmem:[#allocation7 + $0x250] sm:$0xff] }
  0x4f   : > { %928 = vmatmul.msk.f32.vlgmr.msrb.gmra.mxu3 %vm365_vm1, %v492_v53  ;;  %658 = vmatpush.msra.mxu1 %v645_v5  ;;  %v623_v53 = vld [vmem:[#allocation7 + $0x28] sm:$0xff]  ;;  %v696_v4 = vld [vmem:[#allocation7 + $0x110] sm:$0xff] }
  0x50   : > { %672 = vmatpush.msra.mxu2 %v633_v11  ;;  %710 = vmatpush.msra.mxu3 %v709_v12  ;;  %v739_v5 = vld [vmem:[#allocation7 + $0x1b0] sm:$0xff]  ;;  %v738_v11 = vld [vmem:[#allocation7 + $0x1a8] sm:$0xff] }
  0x51   : > { %659 = vmatpush.msra.mxu1 %v644_v6  ;;  %749 = vmatpush.msra.mxu0 %v748_v27 }
  0x52   : > { %673 = vmatpush.msra.mxu2 %v632_v14  ;;  %711 = vmatpush.msra.mxu3 %v708_v15  ;;  %v618_v14 = vld [vmem:[#allocation7] sm:$0xff] }
  0x53   : > { %660 = vmatpush.msra.mxu1 %v643_v7  ;;  %750 = vmatpush.msra.mxu0 %v747_v31  ;;  %v778_v7 = vld [vmem:[#allocation7 + $0x230] sm:$0xff]  ;;  %v694_v15 = vld [vmem:[#allocation7 + $0x100] sm:$0xff] }
  0x54   : > { %925 = vmatmul.msk.f32.vlgmr.msrb.gmra.mxu2 %vm365_vm1, %v442_v58  ;;  %712 = vmatpush.msra.mxu3 %v707_v19  ;;  %v698_v58 = vld [vmem:[#allocation7 + $0x120] sm:$0xff] }
  0x55   : > { %661 = vmatpush.msra.mxu1 %v642_v8  ;;  %674 = vmatpush.msra.mxu2 %v631_v18  ;;  %v776_v19 = vld [vmem:[#allocation7 + $0x220] sm:$0xff] }
  0x56   : > { %932 = vmatmul.msk.f32.gmra.mxu0 %vm365_vm1, %v544_v59  ;;  %713 = vmatpush.msra.mxu3 %v706_v22  ;;  %v741_v59 = vld [vmem:[#allocation7 + $0x1c0] sm:$0xff] }
  0x57   : > { %929 = vmatmul.msk.f32.gmra.mxu3 %vm365_vm1, %v494_v60  ;;  %662 = vmatpush.msra.mxu1 %v641_v9  ;;  %v780_v60 = vld [vmem:[#allocation7 + $0x240] sm:$0xff]  ;;  %v619_v9 = vld [vmem:[#allocation7 + $0x8] sm:$0xff] }
  0x58   : > { %675 = vmatpush.msra.mxu2 %v630_v21  ;;  %714 = vmatpush.msra.mxu3 %v705_v26  ;;  %v775_v21 = vld [vmem:[#allocation7 + $0x218] sm:$0xff] }
  0x59   : > { %663 = vmatpush.msra.mxu1 %v640_v10  ;;  %751 = vmatpush.msra.mxu0 %v746_v36  ;;  %v695_v10 = vld [vmem:[#allocation7 + $0x108] sm:$0xff]  ;;  %v733_v36 = vld [vmem:[#allocation7 + $0x180] sm:$0xff] }
  0x5a   : > { %676 = vmatpush.msra.mxu2 %v629_v25  ;;  %715 = vmatpush.msra.mxu3 %v704_v30  ;;  %v774_v25 = vld [vmem:[#allocation7 + $0x210] sm:$0xff]  ;;  %v773_v30 = vld [vmem:[#allocation7 + $0x208] sm:$0xff] }
  0x5b   : > { %664 = vmatpush.msra.mxu1 %v639_v13  ;;  %752 = vmatpush.msra.mxu0 %v745_v40  ;;  %v777_v13 = vld [vmem:[#allocation7 + $0x228] sm:$0xff] }
  0x5c   : > { %926 = vmatmul.msk.f32.gmra.mxu2 %vm365_vm1, %v444_v62  ;;  %716 = vmatpush.msra.mxu3 %v703_v35  ;;  %v621_v62 = vld [vmem:[#allocation7 + $0x18] sm:$0xff] }
  0x5d   : > { %665 = vmatpush.msra.mxu1 %v638_v16  ;;  %677 = vmatpush.msra.mxu2 %v628_v29  ;;  %v737_v16 = vld [vmem:[#allocation7 + $0x1a0] sm:$0xff]  ;;  %v734_v29 = vld [vmem:[#allocation7 + $0x188] sm:$0xff] }
  0x5e   : > { %933 = vmatmul.msk.f32.gmra.mxu0 %vm365_vm1, %v543_v56  ;;  %717 = vmatpush.msra.mxu3 %v702_v39  ;;  %v781_v56 = vld [vmem:[#allocation7 + $0x248] sm:$0xff] }
  0x5f   : > { %930 = vmatmul.msk.f32.gmra.mxu3 %vm365_vm1, %v493_v57  ;;  %666 = vmatpush.msra.mxu1 %v637_v20  ;;  %v622_v57 = vld [vmem:[#allocation7 + $0x20] sm:$0xff]  ;;  %v736_v20 = vld [vmem:[#allocation7 + $0x198] sm:$0xff] }
  0x60   : > { %678 = vmatpush.msra.mxu2 %v627_v34  ;;  %718 = vmatpush.msra.mxu3 %v701_v44 }
  0x61   : > { %667 = vmatpush.msra.mxu1 %v636_v23  ;;  %753 = vmatpush.msra.mxu0 %v744_v45  ;;  %v1010_v23 = vld [vmem:[%s1382_s3] ss:$0 sm:$0xff] }
  0x62   : > { %679 = vmatpush.msra.mxu2 %v626_v38  ;;  %719 = vmatpush.msra.mxu3 %v700_v49 }
  0x63   : > { %788 = vmatpush.msrb.mxu1 %v787_v28  ;;  %754 = vmatpush.msra.mxu0 %v743_v50 }
  0x64   : > { %927 = vmatmul.msk.f32.gmra.mxu2 %vm365_vm1, %v443_v61  ;;  %720 = vmatpush.msra.mxu3 %v699_v54 }
  0x65   : > { %789 = vmatpush.msrb.mxu1 %v786_v32  ;;  %680 = vmatpush.msra.mxu2 %v625_v43 }
  0x66   : > { %755 = vmatpush.msra.mxu0 %v742_v55  ;;  %721 = vmatpush.msra.mxu3 %v698_v58 }
  0x67   : > { %790 = vmatpush.msrb.mxu1 %v785_v37  ;;  %681 = vmatpush.msra.mxu2 %v624_v48  ;;  %v772_v37 = vld [vmem:[#allocation7 + $0x200] sm:$0xff] }
  0x68   : > { %756 = vmatpush.msra.mxu0 %v741_v59  ;;  %722 = vmatpush.msra.mxu3 %v697_v63 }
  0x69   : > { %791 = vmatpush.msrb.mxu1 %v784_v41  ;;  %682 = vmatpush.msra.mxu2 %v623_v53 }
  0x6a   : > { %757 = vmatpush.msra.mxu0 %v740_v0  ;;  %723 = vmatpush.msra.mxu3 %v696_v4 }
  0x6b   : > { %792 = vmatpush.msrb.mxu1 %v783_v46  ;;  %683 = vmatpush.msra.mxu2 %v622_v57 }
  0x6c   : > { %758 = vmatpush.msra.mxu0 %v739_v5  ;;  %724 = vmatpush.msra.mxu3 %v695_v10  ;;  %v1012_v10 = vld [vmem:[%s1385_s6] ss:$0 sm:$0xff] }
  0x6d   : > { %793 = vmatpush.msrb.mxu1 %v782_v51  ;;  %684 = vmatpush.msra.mxu2 %v621_v62 }
  0x6e   : > { %759 = vmatpush.msra.mxu0 %v738_v11  ;;  %725 = vmatpush.msra.mxu3 %v694_v15 }
  0x6f   : > { %794 = vmatpush.msrb.mxu1 %v781_v56  ;;  %685 = vmatpush.msra.mxu2 %v620_v3 }
  0x70   : > { %760 = vmatpush.msra.mxu0 %v737_v16 }
  0x71   : > { %795 = vmatpush.msrb.mxu1 %v780_v60  ;;  %686 = vmatpush.msra.mxu2 %v619_v9 }
  0x72   : > { %761 = vmatpush.msra.mxu0 %v736_v20 }
  0x73   : > { %796 = vmatpush.msrb.mxu1 %v779_v1  ;;  %687 = vmatpush.msra.mxu2 %v618_v14 }
  0x75   : > { %797 = vmatpush.msrb.mxu1 %v778_v7  ;;  %v1011_v7 = vld [vmem:[%s1384_s5] ss:$0 sm:$0xff] }
  0x77   : > { %798 = vmatpush.msrb.mxu1 %v777_v13 }
  0x79   : > { %799 = vmatpush.msrb.mxu1 %v776_v19 }
  0x7b   : > { %800 = vmatpush.msrb.mxu1 %v775_v21 }
  0x7d   : > { %801 = vmatpush.msrb.mxu1 %v774_v25 }
  0x7f   : > { %802 = vmatpush.msrb.mxu1 %v773_v30 }
  0x81   : > { %803 = vmatpush.msrb.mxu1 %v772_v37 }
  0xba   : > { %v1333_v24 = vpop.f32.mrf.mxu0 }
  0xbf   : > { %v1331_v17 = vpop.f32.mrf.mxu2 }
  0xc0   : > { %v422_v6 = vadd.f32 %v1331_v17, %v1333_v24  ;;  %v1009_v17 = vld [vmem:[%s1381_s2] ss:$0 sm:$0xff]  ;;  %v735_v24 = vld [vmem:[#allocation7 + $0x190] sm:$0xff] }
  0xc1   : > { %762 = vmatpush.msra.mxu0 %v735_v24 }
  0xc2   : > { %v1337_v42 = vpop.f32.mrf.mxu3 }
  0xc3   : > { %v1339_v47 = vpop.f32.mrf.mxu0  ;;  %763 = vmatpush.msra.mxu0 %v734_v29 }
  0xc5   : > { %764 = vmatpush.msra.mxu0 %v733_v36 }
  0xc7   : > { %v1335_v33 = vpop.f32.mrf.mxu2 }
  0xc8   : > { %v425_v27 = vadd.f32 %v1335_v33, %v1339_v47 }
  0xcb   : > { %v568_v2 = vpop.f32.mrf.mxu0 }
  0xcf   : > { %v1341_v52 = vpop.f32.mrf.mxu2 }
  0xd0   : > { %v428_v33 = vadd.f32 %v1341_v52, %v1337_v42 }
  0xd2   : > { %v518_v61 = vpop.f32.mrf.mxu3 }
  0xd3   : > { %v571_v32 = vpop.f32.mrf.mxu0 }
  0xd7   : > { %v468_v8 = vpop.f32.mrf.mxu2 }
  0xd8   : > { %v477_v12 = vadd.f32 %v468_v8, %v422_v6 }
  0xda   : > { %v527_v18 = vadd.f32 %v518_v61, %v477_v12  ;;  %v521_v26 = vpop.f32.mrf.mxu3 }
  0xdb   : > { %v574_v49 = vpop.f32.mrf.mxu0 }
  0xdc   : > { %v577_v22 = vadd.f32 %v568_v2, %v527_v18 }
  0xde   : > { %v583_v28 = vmul.f32 %v1009_v17, %v577_v22 }
  0xdf   : > { %v471_v31 = vpop.f32.mrf.mxu2 }
  0xe0   : > { %v589_v34 = vadd.f32 %v1010_v23, %v583_v28  ;;  %v478_v35 = vadd.f32 %v471_v31, %v425_v27 }
  0xe2   : > { %v592_v38 = vmax.f32 %v589_v34, 0.0  ;;  %v528_v39 = vadd.f32 %v521_v26, %v478_v35  ;;  %v524_v46 = vpop.f32.mrf.mxu3 }
  0xe4   : > { %v596_v40 = vrot.slane %v592_v38, 1  ;;  %v578_v41 = vadd.f32 %v571_v32, %v528_v39 }
  0xe6   : > { %v598_v43 = vmax.f32 %v592_v38, %v596_v40  ;;  %v584_v44 = vmul.f32 %v1009_v17, %v578_v41 }
  0xe7   : > { %v474_v45 = vpop.f32.mrf.mxu2 }
  0xe8   : > { %599 = vst [vmem:[#allocation2] sm:$0x1] %v598_v43  ;;  %v590_v47 = vadd.f32 %v1010_v23, %v584_v44  ;;  %v479_v48 = vadd.f32 %v474_v45, %v428_v33 }
  0xe9   : > { %600 = vst [vmem:[#allocation2 - $0x1] sm:$0x4] %v598_v43 }
  0xea   : > { %601 = vst [vmem:[#allocation2 - $0x2] sm:$0x10] %v598_v43  ;;  %v593_v50 = vmax.f32 %v590_v47, 0.0  ;;  %v529_v51 = vadd.f32 %v524_v46, %v479_v48 }
  0xeb   : > { %602 = vst [vmem:[#allocation2 - $0x3] sm:$0x40] %v598_v43 }
  0xec   : > { %v604_v53 = vrot.slane %v593_v50, 1  ;;  %v579_v54 = vadd.f32 %v574_v49, %v529_v51 }
  0xee   : > { %v606_v55 = vmax.f32 %v593_v50, %v604_v53  ;;  %v585_v56 = vmul.f32 %v1009_v17, %v579_v54 }
  0xf0   : > { %607 = vst [vmem:[#allocation2 + $0x4] sm:$0x1] %v606_v55  ;;  %v591_v57 = vadd.f32 %v1010_v23, %v585_v56 }
  0xf1   : > { %608 = vst [vmem:[#allocation2 + $0x3] sm:$0x4] %v606_v55 }
  0xf2   : > { %609 = vst [vmem:[#allocation2 + $0x2] sm:$0x10] %v606_v55  ;;  %v594_v42 = vmax.f32 %v591_v57, 0.0 }
  0xf3   : > { %610 = vst [vmem:[#allocation2 + $0x1] sm:$0x40] %v606_v55 }
  0xf4   : > { %v612_v52 = vrot.slane %v594_v42, 1 }
  0xf6   : > { %v614_v58 = vmax.f32 %v594_v42, %v612_v52 }
  0xf8   : > { %615 = vst [vmem:[#allocation2 + $0x8] sm:$0x1] %v614_v58  ;;  %v617_v59 = vld [vmem:[#allocation2] sm:$0x3f] }
  0xf9   : > { %616 = vst [vmem:[#allocation2 + $0x7] sm:$0x4] %v614_v58  ;;  %v634_v60 = vld [vmem:[#allocation2 + $0x1] sm:$0x3f]  ;;  %688 = vmatmul.f32.vlgmr.msra.gmra.mxu2 %v617_v59 }
  0xfa   : > { %668 = vmatmul.f32.vlgmr.msra.gmra.mxu1 %v634_v60  ;;  %v692_v61 = vld [vmem:[#allocation2 + $0x2] sm:$0x3f] }
  0xfb   : > { %726 = vmatmul.f32.vlgmr.msra.gmra.mxu3 %v692_v61 }
  0xff   : > { %v731_v62 = vld [vmem:[#allocation2 + $0x3] sm:$0x3f] }
 0x100   : > { %765 = vmatmul.f32.vlgmr.msra.gmra.mxu0 %v731_v62  ;;  %v770_v63 = vld [vmem:[#allocation2 + $0x4] sm:$0x3f] }
 0x102   : > { %804 = vmatmul.f32.vlgmr.msrb.gmra.mxu1 %v770_v63 }
 0x177   : > { %v669_v0 = vpop.f32.mrf.mxu1 }
 0x17c   : > { %v689_v1 = vpop.f32.mrf.mxu2 }
 0x17d   : > { %v690_v2 = vadd.f32 %v689_v1, %v669_v0  ;;  %v766_v5 = vpop.f32.mrf.mxu0 }
 0x17e   : > { %v727_v3 = vpop.f32.mrf.mxu3 }
 0x17f   : > { %v730_v4 = vadd.f32 %v727_v3, %v690_v2  ;;  %v805_v8 = vpop.f32.mrf.mxu1 }
 0x181   : > { %v769_v6 = vadd.f32 %v766_v5, %v730_v4 }
 0x183   : > { %v808_v9 = vadd.f32 %v805_v8, %v769_v6 }
 0x185   : > { %v812_v11 = vmul.f32 %v1011_v7, %v808_v9 }
 0x187   : > { %v816_v12 = vadd.f32 %v1012_v10, %v812_v11 }
 0x189   : > { %v817_v13 = vmax.f32 %v816_v12, 0.0 }
 0x18b   : > { %v819_v14 = vrot.slane %v817_v13, 1 }
 0x18d   : > { %v821_v15 = vmax.f32 %v817_v13, %v819_v14 }
 0x18f   : > { %822 = vst [vmem:[%s331_s12] sm:$0x1] %v821_v15 }
 0x190   : > { %823 = vst [vmem:[%s331_s12 - $0x1] sm:$0x4] %v821_v15 }
 0x191   : > { %824 = vst [vmem:[%s331_s12 - $0x2] sm:$0x10] %v821_v15 }
 0x192 PF: > { %s1392_s8 = smov %s1250_s24  ;;  %p18_p4 = scmp.ge.s32.totalorder %s1239_s20, 4  }
 0x193   : > { %s1393_s24 = smov %s1133_s25  ;;  %s1394_s25 = smov %s1137_s26 }
 0x194   : > { %s1395_s26 = smov %s1392_s8  ;;  %s1396_s27 = smov %s1239_s20 }
 0x195   :  { %20 = sbr.rel (!%p18_p4) target bundleno = 4 (0x4), region = 104 }
 0x19a   :  { %844 = vsyncpa [#allocation4], 1 }
 0x19b   :  { %846 = vsyncpa [#allocation4 + $0x1], 1 }
 0x19c   :  { %847 = vsyncpa [#allocation6], 1 }

</bundles_post_ra>
